<compile_context>
chip_gen: v5e
topology: v5e:2x2
jax: 0.10.0
libtpu: 0.0.40
codegen_flags: <defaults>
</compile_context>

<pallas_src>
import math

import jax
import jax.numpy as jnp
from jax.experimental import pallas as pl
from jax.experimental.pallas import tpu as pltpu


def _scalable_tanh_kernel(x_ref, scale_ref, o_ref):
    # x_ref:     (block_rows, width)
    # scale_ref: (1, width)  -- broadcasts over sublanes (rows)
    # o_ref:     (block_rows, width)
    x = x_ref[...].astype(jnp.float32)       # tanh in f32 (v5e EUP has no bf16)
    s = scale_ref[...].astype(jnp.float32)
    o_ref[...] = (s * jnp.tanh(x)).astype(o_ref.dtype)


def _sublane(dtype) -> int:
    nbytes = jnp.dtype(dtype).itemsize
    if nbytes >= 4:
        return 8
    if nbytes == 2:
        return 16
    return 32


def scalable_tanh(x, scale, *, target_tile_bytes=2 * 1024 * 1024):
    """out = scale * tanh(x); scale has shape (hidden,) and broadcasts over
    the last dimension of x."""
    orig_shape = x.shape
    hidden = orig_shape[-1]
    assert scale.shape == (hidden,), (scale.shape, hidden)

    # ---- Flatten leading dims: (rows, hidden), hidden on the lane axis.
    x2 = x.reshape(-1, hidden)
    rows = x2.shape[0]

    # ---- Lane-dense packing when hidden is not a multiple of 128.
    width = hidden
    scale_row = scale
    if hidden % 128 != 0:
        k = math.lcm(hidden, 128) // hidden
        if k > 1 and rows % k == 0:
            width = hidden * k
            x2 = x2.reshape(rows // k, width)
            scale_row = jnp.tile(scale, k)
        # else: fall back to the unpacked layout (still correct, just
        # lane-sparse). # TODO(synk): pad rows to a multiple of k if this
        # path ever shows up hot.
    packed_rows = x2.shape[0]
    scale2 = scale_row.reshape(1, width)

    # ---- Pick block_rows: ~target_tile_bytes per input tile, sublane-aligned.
    dtype_bytes = jnp.dtype(x.dtype).itemsize
    sub = _sublane(x.dtype)
    bytes_per_row = width * dtype_bytes
    br = max(1, target_tile_bytes // bytes_per_row)
    if br >= packed_rows:
        block_rows = packed_rows              # single block == full extent
    else:
        block_rows = max(sub, (br // sub) * sub)
        block_rows = min(block_rows, packed_rows)
    grid = (pl.cdiv(packed_rows, block_rows),)

    def _call(scale_pipeline_mode):
        if scale_pipeline_mode is not None:
            scale_spec = pl.BlockSpec(
                (1, width), lambda i: (0, 0), pipeline_mode=scale_pipeline_mode
            )
        else:
            scale_spec = pl.BlockSpec((1, width), lambda i: (0, 0))
        return pl.pallas_call(
            _scalable_tanh_kernel,
            out_shape=jax.ShapeDtypeStruct((packed_rows, width), x.dtype),
            grid_spec=pltpu.PrefetchScalarGridSpec(
                num_scalar_prefetch=0,
                grid=grid,
                in_specs=[
                    pl.BlockSpec((block_rows, width), lambda i: (i, 0)),
                    scale_spec,
                ],
                out_specs=pl.BlockSpec((block_rows, width), lambda i: (i, 0)),
            ),
            compiler_params=pltpu.CompilerParams(
                dimension_semantics=("parallel",),      # megacore on v7x
                vmem_limit_bytes=32 * 1024 * 1024,      # safe on v5e/v6e/v7x
            ),
        )(x2, scale2)

    try:
        # scale is grid-invariant: a single VMEM buffer is enough.
        out2 = _call(pl.Buffered(1))
    except Exception:
        out2 = _call(None)

    return out2.reshape(orig_shape)


if __name__ == "__main__":
    # input_size (= hidden) matches ScalableTanh(input_size)
    batch, seq, hidden = 2, 8, 32

    key = jax.random.PRNGKey(0)
    kx, ks = jax.random.split(key)

    x = jax.random.normal(kx, (batch, seq, hidden), dtype=jnp.float32)
    # Deterministic init mirroring torch.randn(input_size) * 0.01
    scale = jax.random.normal(ks, (hidden,), dtype=jnp.float32) * 0.01

    out = scalable_tanh(x, scale)
    out = jax.block_until_ready(out)

    # Pure-JAX reference check.
    ref = scale * jnp.tanh(x)
    assert out.shape == x.shape
    assert jnp.allclose(out, ref, atol=1e-6, rtol=1e-6), "mismatch vs reference"

    print("KERNEL_OK")
</pallas_src>

<mosaic_0001>
module attributes {stable_mosaic.version = 11 : i64} {
  func.func @_scalable_tanh_kernel(%arg0: i32, %arg1: memref<4x128xf32, #tpu.memory_space<vmem>>, %arg2: memref<1x128xf32, #tpu.memory_space<vmem>>, %arg3: memref<4x128xf32, #tpu.memory_space<vmem>>) attributes {dimension_semantics = [#tpu.dimension_semantics<parallel>], iteration_bounds = array<i64: 1>, scalar_prefetch = 0 : i64, scratch_operands = 0 : i64, tpu.core_type = #tpu.core_type<tc>, window_params = [{transform_indices = @transform_0, window_bounds = array<i64: 4, 128>}, {pipeline_mode = #tpu.pipeline_mode<synchronous>, transform_indices = @transform_1, window_bounds = array<i64: 1, 128>}, {transform_indices = @transform_2, window_bounds = array<i64: 4, 128>}]} {
    %c0 = arith.constant 0 : index
    %c0_0 = arith.constant 0 : index
    %0 = vector.load %arg1[%c0, %c0_0] : memref<4x128xf32, #tpu.memory_space<vmem>>, vector<4x128xf32>
    %c0_1 = arith.constant 0 : index
    %c0_2 = arith.constant 0 : index
    %1 = vector.load %arg2[%c0_1, %c0_2] : memref<1x128xf32, #tpu.memory_space<vmem>>, vector<1x128xf32>
    %2 = math.tanh %0 : vector<4x128xf32>
    %3 = vector.broadcast %1 : vector<1x128xf32> to vector<4x128xf32>
    %4 = arith.mulf %3, %2 : vector<4x128xf32>
    %c0_3 = arith.constant 0 : index
    %c0_4 = arith.constant 0 : index
    %5 = vector.load %arg3[%c0_3, %c0_4] : memref<4x128xf32, #tpu.memory_space<vmem>>, vector<4x128xf32>
    tpu.vector_store %arg3[%c0_3, %c0_4], %4 {strides = array<i32>} : memref<4x128xf32, #tpu.memory_space<vmem>>, vector<4x128xf32>,
    return
  }
  func.func @transform_0(%arg0: i32) -> (i32, i32) {
    %c0_i32 = arith.constant 0 : i32
    %c0_i32_0 = arith.constant 0 : i32
    return %arg0, %c0_i32 : i32, i32
  }
  func.func @transform_1(%arg0: i32) -> (i32, i32) {
    %c0_i32 = arith.constant 0 : i32
    %c0_i32_0 = arith.constant 0 : i32
    %c0_i32_1 = arith.constant 0 : i32
    return %c0_i32, %c0_i32_0 : i32, i32
  }
  func.func @transform_2(%arg0: i32) -> (i32, i32) {
    %c0_i32 = arith.constant 0 : i32
    %c0_i32_0 = arith.constant 0 : i32
    return %arg0, %c0_i32 : i32, i32
  }
}

module attributes {stable_mosaic.version = 11 : i64} {
  func.func @_scalable_tanh_kernel(%arg0: i32, %arg1: memref<4x128xf32, #tpu.memory_space<vmem>>, %arg2: memref<1x128xf32, #tpu.memory_space<vmem>>, %arg3: memref<4x128xf32, #tpu.memory_space<vmem>>) attributes {dimension_semantics = [#tpu.dimension_semantics<parallel>], iteration_bounds = array<i64: 1>, scalar_prefetch = 0 : i64, scratch_operands = 0 : i64, tpu.core_type = #tpu.core_type<tc>, window_params = [{transform_indices = @transform_0, window_bounds = array<i64: 4, 128>}, {pipeline_mode = #tpu.pipeline_mode<synchronous>, transform_indices = @transform_1, window_bounds = array<i64: 1, 128>}, {transform_indices = @transform_2, window_bounds = array<i64: 4, 128>}]} {
    %c0 = arith.constant 0 : index
    %c0_0 = arith.constant 0 : index
    %0 = vector.load %arg1[%c0, %c0_0] : memref<4x128xf32, #tpu.memory_space<vmem>>, vector<4x128xf32>
    %c0_1 = arith.constant 0 : index
    %c0_2 = arith.constant 0 : index
    %1 = vector.load %arg2[%c0_1, %c0_2] : memref<1x128xf32, #tpu.memory_space<vmem>>, vector<1x128xf32>
    %2 = math.tanh %0 : vector<4x128xf32>
    %3 = vector.broadcast %1 : vector<1x128xf32> to vector<4x128xf32>
    %4 = arith.mulf %3, %2 : vector<4x128xf32>
    %c0_3 = arith.constant 0 : index
    %c0_4 = arith.constant 0 : index
    %5 = vector.load %arg3[%c0_3, %c0_4] : memref<4x128xf32, #tpu.memory_space<vmem>>, vector<4x128xf32>
    tpu.vector_store %arg3[%c0_3, %c0_4], %4 {strides = array<i32>} : memref<4x128xf32, #tpu.memory_space<vmem>>, vector<4x128xf32>,
    return
  }
  func.func @transform_0(%arg0: i32) -> (i32, i32) {
    %c0_i32 = arith.constant 0 : i32
    %c0_i32_0 = arith.constant 0 : i32
    return %arg0, %c0_i32 : i32, i32
  }
  func.func @transform_1(%arg0: i32) -> (i32, i32) {
    %c0_i32 = arith.constant 0 : i32
    %c0_i32_0 = arith.constant 0 : i32
    %c0_i32_1 = arith.constant 0 : i32
    return %c0_i32, %c0_i32_0 : i32, i32
  }
  func.func @transform_2(%arg0: i32) -> (i32, i32) {
    %c0_i32 = arith.constant 0 : i32
    %c0_i32_0 = arith.constant 0 : i32
    return %arg0, %c0_i32 : i32, i32
  }
}

</mosaic_0001>

<bundles_post_ra>
// kernel: tpu_custom_call.1
= control target key start
LH: loop header
LB: loop body
LE: loop exit
PB: predicated region body
PF: predicated region fallthrough
CT: control target
= control target key end

     0   :  { %7 = vsyncpa [#allocation3], 0  ;;  %s177_s0 = inlined_call_operand.hbm [shape: f32[4,128], index: 0, kind: input, shape index: {}]   ;;  %s178_s1 = inlined_call_operand.hbm [shape: f32[1,128], index: 1, kind: input, shape index: {}]   ;;  %s179_s2 = inlined_call_operand.hbm [shape: f32[4,128], index: 2, kind: output, shape index: {}]  }
   0x1   :  { %8 = vsyncpa [#allocation6], 0 }
   0x2   :  { %9 = vsyncpa [#allocation4], 0  ;;  %s15_s11 = sshll.u32 %s177_s0, 4  ;;  %s150_s12 = smov [#allocation2]   ;;  %s16_s11 = int_to_ptr.hbm [resolvable:$true] %s15_s11 }
   0x3   :  { %s17_s13 = sshll.u32 %s150_s12, 4  ;;  %s26_s16 = sshll.u32 %s178_s1, 4  ;;  %s18_s13 = int_to_ptr.vmem [resolvable:$true] %s17_s13  ;;  %s27_s16 = int_to_ptr.hbm [resolvable:$true] %s26_s16 }
   0x4   :  { %20 = dma.hbm_to_vmem [thread:$0]  %s16_s11, 64, %s18_s13, [#allocation3]  }
   0x5   :  { %s151_s17 = smov [#allocation5]  }
   0x6   :  { %s28_s18 = sshll.u32 %s151_s17, 4  ;;  %s29_s18 = int_to_ptr.vmem [resolvable:$true] %s28_s18 }
   0x7   :  { %31 = dma.hbm_to_vmem [thread:$0]  %s27_s16, 16, %s29_s18, [#allocation6]  }
   0x8   :  { %144 = dma.done.wait [#allocation3], 64  }
   0x9   :  { %145 = vsyncadd [#allocation3], 4294967232 }
   0xa   :  { %146 = dma.done.wait [#allocation6], 16  }
   0xb   :  { %147 = vsyncadd [#allocation6], 4294967280  ;;  %v40_v0 = vld [vmem:[#allocation2] sm:$0xf]  ;;  %v69_v1 = vld [vmem:[#allocation5] ss:$0 sm:$0xff] }
   0xc   :  { %70 = vtanh.f32 %v40_v0  ;;  %s152_s0 = smov [#allocation7]   ;;  %s55_s22 = sshll.u32 %s179_s2, 4  ;;  %s56_s22 = int_to_ptr.hbm [resolvable:$true] %s55_s22 }
   0xd   :  { %s53_s19 = sshll.u32 %s152_s0, 4  ;;  %s54_s19 = int_to_ptr.vmem [resolvable:$true] %s53_s19 }
  0x12   :  { %v71_v2 = vpop.eup %70 }
  0x13   :  { %v46_v3 = vmul.f32 %v71_v2, %v69_v1 }
  0x15   :  { %47 = vst [vmem:[#allocation7] sm:$0xf] %v46_v3 }
  0x16   :  { %58 = dma.vmem_to_hbm [thread:$0]  %s54_s19, 64, %s56_s22, [#allocation4]  }
  0x17   :  { %148 = dma.done.wait [#allocation4], 64  }
  0x18   :  { %149 = vsyncadd [#allocation4], 4294967232 }
  0x19   :  { %63 = vsyncpa [#allocation3], 1 }
  0x1a   :  { %64 = vsyncpa [#allocation6], 1 }
  0x1b   :  { %65 = vsyncpa [#allocation4], 1 }

// kernel: tpu_custom_call.1
= control target key start
LH: loop header
LB: loop body
LE: loop exit
PB: predicated region body
PF: predicated region fallthrough
CT: control target
= control target key end

     0   :  { %7 = vsyncpa [#allocation3], 0  ;;  %s177_s0 = inlined_call_operand.hbm [shape: f32[4,128], index: 0, kind: input, shape index: {}]   ;;  %s178_s1 = inlined_call_operand.hbm [shape: f32[1,128], index: 1, kind: input, shape index: {}]   ;;  %s179_s2 = inlined_call_operand.hbm [shape: f32[4,128], index: 2, kind: output, shape index: {}]  }
   0x1   :  { %8 = vsyncpa [#allocation6], 0 }
   0x2   :  { %9 = vsyncpa [#allocation4], 0  ;;  %s15_s11 = sshll.u32 %s177_s0, 4  ;;  %s150_s12 = smov [#allocation2]   ;;  %s16_s11 = int_to_ptr.hbm [resolvable:$true] %s15_s11 }
   0x3   :  { %s17_s13 = sshll.u32 %s150_s12, 4  ;;  %s26_s16 = sshll.u32 %s178_s1, 4  ;;  %s18_s13 = int_to_ptr.vmem [resolvable:$true] %s17_s13  ;;  %s27_s16 = int_to_ptr.hbm [resolvable:$true] %s26_s16 }
   0x4   :  { %20 = dma.hbm_to_vmem [thread:$0]  %s16_s11, 64, %s18_s13, [#allocation3]  }
   0x5   :  { %s151_s17 = smov [#allocation5]  }
   0x6   :  { %s28_s18 = sshll.u32 %s151_s17, 4  ;;  %s29_s18 = int_to_ptr.vmem [resolvable:$true] %s28_s18 }
   0x7   :  { %31 = dma.hbm_to_vmem [thread:$0]  %s27_s16, 16, %s29_s18, [#allocation6]  }
   0x8   :  { %144 = dma.done.wait [#allocation3], 64  }
   0x9   :  { %145 = vsyncadd [#allocation3], 4294967232 }
   0xa   :  { %146 = dma.done.wait [#allocation6], 16  }
   0xb   :  { %147 = vsyncadd [#allocation6], 4294967280  ;;  %v40_v0 = vld [vmem:[#allocation2] sm:$0xf]  ;;  %v69_v1 = vld [vmem:[#allocation5] ss:$0 sm:$0xff] }
   0xc   :  { %70 = vtanh.f32 %v40_v0  ;;  %s152_s0 = smov [#allocation7]   ;;  %s55_s22 = sshll.u32 %s179_s2, 4  ;;  %s56_s22 = int_to_ptr.hbm [resolvable:$true] %s55_s22 }
   0xd   :  { %s53_s19 = sshll.u32 %s152_s0, 4  ;;  %s54_s19 = int_to_ptr.vmem [resolvable:$true] %s53_s19 }
  0x12   :  { %v71_v2 = vpop.eup %70 }
  0x13   :  { %v46_v3 = vmul.f32 %v71_v2, %v69_v1 }
  0x15   :  { %47 = vst [vmem:[#allocation7] sm:$0xf] %v46_v3 }
  0x16   :  { %58 = dma.vmem_to_hbm [thread:$0]  %s54_s19, 64, %s56_s22, [#allocation4]  }
  0x17   :  { %148 = dma.done.wait [#allocation4], 64  }
  0x18   :  { %149 = vsyncadd [#allocation4], 4294967232 }
  0x19   :  { %63 = vsyncpa [#allocation3], 1 }
  0x1a   :  { %64 = vsyncpa [#allocation6], 1 }
  0x1b   :  { %65 = vsyncpa [#allocation4], 1 }

</bundles_post_ra>
